<compile_context>
chip_gen: v7x
topology: tpu7x:2x2x1
jax: 0.10.0
libtpu: 0.0.40
codegen_flags: <defaults>
</compile_context>

<pallas_src>
import jax
import jax.numpy as jnp
from jax.experimental import pallas as pl
from jax.experimental.pallas import tpu as pltpu


# ---------------------------------------------------------------------------
# Shared per-step compute (operates on already-loaded VMEM values, VPU only).
# ---------------------------------------------------------------------------
def _mycell_step(x, h, wt, b):
    """One MyCell step. x,h: (B,F); wt: (F_in,F_out) = W^T; b: (1,F_out)."""
    B, K = x.shape
    F_out = wt.shape[1]
    # Linear: y = x @ W^T + b, as K unrolled VPU broadcast-multiply-adds
    # (avoids the MXU result-FIFO latency for a 3x4x4 payload).
    y = jnp.broadcast_to(b, (B, F_out)).astype(jnp.float32)
    for k in range(K):  # K = 4, static unroll
        y = y + x[:, k:k + 1] * wt[k:k + 1, :]
    # MyDecisionGate: y if sum(y) > 0 else -y  ==  y * sign(sum(y))
    s = jnp.sum(y)
    sign = jnp.where(s > 0.0, jnp.float32(1.0), jnp.float32(-1.0))
    # new_h = tanh(gated + h)   (EUP transcendental)
    return jnp.tanh(y * sign + h)


# ---------------------------------------------------------------------------
# Single-step kernel (exact module semantics).
# ---------------------------------------------------------------------------
def _mycell_kernel(x_ref, h_ref, wt_ref, b_ref, out_ref):
    out_ref[...] = _mycell_step(x_ref[...], h_ref[...], wt_ref[...], b_ref[...])


def mycell_forward(x, h, w, b):
    """Pallas-backed MyCell forward. Returns (new_h, new_h) like the module.

    w is the torch.nn.Linear weight with layout (out_features, in_features).
    """
    B, F = x.shape
    assert h.shape == (B, F) and w.shape == (F, F) and b.shape == (F,)
    wt = jnp.transpose(w)      # (in, out), materialized once in the wrapper
    b2d = b.reshape(1, F)      # lane-friendly 2-D bias

    vmem_full = pl.BlockSpec(memory_space=pltpu.MemorySpace.VMEM)
    new_h = pl.pallas_call(
        _mycell_kernel,
        out_shape=jax.ShapeDtypeStruct((B, F), jnp.float32),
        in_specs=[vmem_full, vmem_full, vmem_full, vmem_full],
        out_specs=vmem_full,
    )(x, h, wt, b2d)
    return new_h, new_h


# ---------------------------------------------------------------------------
# Sequence (RNN) kernel: T MyCell steps in ONE pallas_call.
#   - grid axis over timesteps, "arbitrary" (state carried across steps)
#   - W^T / bias blocks have a constant index_map -> stay resident in VMEM
#   - hidden state lives in a VMEM scratch accumulator
# ---------------------------------------------------------------------------
def _mycell_seq_kernel(x_ref, h0_ref, wt_ref, b_ref, out_ref, h_scr):
    t = pl.program_id(0)

    @pl.when(t == 0)
    def _():
        h_scr[...] = h0_ref[...]

    new_h = _mycell_step(x_ref[0], h_scr[...], wt_ref[...], b_ref[...])
    h_scr[...] = new_h
    out_ref[0] = new_h


def mycell_sequence(x_seq, h0, w, b):
    """Run MyCell over x_seq: (T, B, F) with initial hidden h0: (B, F).

    Returns all hidden states, shape (T, B, F).  Amortizes pallas_call
    dispatch + per-step overhead across the whole sequence.
    """
    T, B, F = x_seq.shape
    assert h0.shape == (B, F) and w.shape == (F, F) and b.shape == (F,)
    wt = jnp.transpose(w)
    b2d = b.reshape(1, F)

    return pl.pallas_call(
        _mycell_seq_kernel,
        out_shape=jax.ShapeDtypeStruct((T, B, F), jnp.float32),
        grid=(T,),
        in_specs=[
            pl.BlockSpec((1, B, F), lambda t: (t, 0, 0)),   # x_t streamed
            pl.BlockSpec((B, F), lambda t: (0, 0)),         # h0 (read at t=0)
            pl.BlockSpec((F, F), lambda t: (0, 0)),         # W^T, resident
            pl.BlockSpec((1, F), lambda t: (0, 0)),         # bias, resident
        ],
        out_specs=pl.BlockSpec((1, B, F), lambda t: (t, 0, 0)),
        scratch_shapes=[pltpu.VMEM((B, F), jnp.float32)],   # carried hidden
        compiler_params=pltpu.CompilerParams(
            dimension_semantics=("arbitrary",)),
    )(x_seq, h0, wt, b2d)


# ---------------------------------------------------------------------------
# Pure-JAX reference.
# ---------------------------------------------------------------------------
def _reference(x, h, w, b):
    y = x @ w.T + b
    gated = jnp.where(jnp.sum(y) > 0.0, y, -y)
    nh = jnp.tanh(gated + h)
    return nh, nh


if __name__ == "__main__":
    key = jax.random.PRNGKey(0)
    kx, kh, kw, kb, ks = jax.random.split(key, 5)

    # Shapes implied by the module: x, h ~ (3, 4); Linear(4, 4).
    x = jax.random.uniform(kx, (3, 4), dtype=jnp.float32)
    h = jax.random.uniform(kh, (3, 4), dtype=jnp.float32)
    w = jax.random.uniform(kw, (4, 4), dtype=jnp.float32, minval=-0.5, maxval=0.5)
    b = jax.random.uniform(kb, (4,), dtype=jnp.float32, minval=-0.5, maxval=0.5)

    # --- single step (module semantics) ---
    new_h, new_h2 = mycell_forward(x, h, w, b)
    jax.block_until_ready(new_h)
    ref_h, _ = _reference(x, h, w, b)
    assert jnp.allclose(new_h, ref_h, atol=1e-5, rtol=1e-5), "step mismatch"
    assert new_h.shape == (3, 4) and new_h.dtype == jnp.float32
    assert (new_h == new_h2).all()

    # --- sequence use (amortized dispatch), checked vs stepwise reference ---
    T = 8
    x_seq = jax.random.uniform(ks, (T, 3, 4), dtype=jnp.float32)
    seq_out = mycell_sequence(x_seq, h, w, b)
    jax.block_until_ready(seq_out)

    h_ref = h
    refs = []
    for t in range(T):
        h_ref, _ = _reference(x_seq[t], h_ref, w, b)
        refs.append(h_ref)
    ref_seq = jnp.stack(refs)
    assert seq_out.shape == (T, 3, 4)
    assert jnp.allclose(seq_out, ref_seq, atol=1e-5, rtol=1e-5), "seq mismatch"

    print("KERNEL_OK")
</pallas_src>

<mosaic_0001>
module attributes {stable_mosaic.version = 11 : i64} {
  func.func @_mycell_kernel(%arg0: memref<3x4xf32, #tpu.memory_space<vmem>>, %arg1: memref<3x4xf32, #tpu.memory_space<vmem>>, %arg2: memref<4x4xf32, #tpu.memory_space<vmem>>, %arg3: memref<1x4xf32, #tpu.memory_space<vmem>>, %arg4: memref<3x4xf32, #tpu.memory_space<vmem>>) attributes {dimension_semantics = [], scalar_prefetch = 0 : i64, scratch_operands = 0 : i64, tpu.core_type = #tpu.core_type<tc>} {
    %c0 = arith.constant 0 : index
    %c0_0 = arith.constant 0 : index
    %0 = vector.load %arg0[%c0, %c0_0] : memref<3x4xf32, #tpu.memory_space<vmem>>, vector<3x4xf32>
    %c0_1 = arith.constant 0 : index
    %c0_2 = arith.constant 0 : index
    %1 = vector.load %arg1[%c0_1, %c0_2] : memref<3x4xf32, #tpu.memory_space<vmem>>, vector<3x4xf32>
    %c0_3 = arith.constant 0 : index
    %c0_4 = arith.constant 0 : index
    %2 = vector.load %arg2[%c0_3, %c0_4] : memref<4x4xf32, #tpu.memory_space<vmem>>, vector<4x4xf32>
    %c0_5 = arith.constant 0 : index
    %c0_6 = arith.constant 0 : index
    %3 = vector.load %arg3[%c0_5, %c0_6] : memref<1x4xf32, #tpu.memory_space<vmem>>, vector<1x4xf32>
    %4 = vector.shape_cast %3 : vector<1x4xf32> to vector<1x4xf32>
    %5 = vector.broadcast %4 : vector<1x4xf32> to vector<3x4xf32>
    %6 = vector.extract_strided_slice %0 {offsets = [0, 0], sizes = [3, 1], strides = [1, 1]} : vector<3x4xf32> to vector<3x1xf32>
    %7 = vector.extract_strided_slice %2 {offsets = [0, 0], sizes = [1, 4], strides = [1, 1]} : vector<4x4xf32> to vector<1x4xf32>
    %8 = vector.broadcast %6 : vector<3x1xf32> to vector<3x4xf32>
    %9 = vector.broadcast %7 : vector<1x4xf32> to vector<3x4xf32>
    %10 = arith.mulf %8, %9 : vector<3x4xf32>
    %11 = arith.addf %5, %10 : vector<3x4xf32>
    %12 = vector.extract_strided_slice %0 {offsets = [0, 1], sizes = [3, 1], strides = [1, 1]} : vector<3x4xf32> to vector<3x1xf32>
    %13 = vector.extract_strided_slice %2 {offsets = [1, 0], sizes = [1, 4], strides = [1, 1]} : vector<4x4xf32> to vector<1x4xf32>
    %14 = vector.broadcast %12 : vector<3x1xf32> to vector<3x4xf32>
    %15 = vector.broadcast %13 : vector<1x4xf32> to vector<3x4xf32>
    %16 = arith.mulf %14, %15 : vector<3x4xf32>
    %17 = arith.addf %11, %16 : vector<3x4xf32>
    %18 = vector.extract_strided_slice %0 {offsets = [0, 2], sizes = [3, 1], strides = [1, 1]} : vector<3x4xf32> to vector<3x1xf32>
    %19 = vector.extract_strided_slice %2 {offsets = [2, 0], sizes = [1, 4], strides = [1, 1]} : vector<4x4xf32> to vector<1x4xf32>
    %20 = vector.broadcast %18 : vector<3x1xf32> to vector<3x4xf32>
    %21 = vector.broadcast %19 : vector<1x4xf32> to vector<3x4xf32>
    %22 = arith.mulf %20, %21 : vector<3x4xf32>
    %23 = arith.addf %17, %22 : vector<3x4xf32>
    %24 = vector.extract_strided_slice %0 {offsets = [0, 3], sizes = [3, 1], strides = [1, 1]} : vector<3x4xf32> to vector<3x1xf32>
    %25 = vector.extract_strided_slice %2 {offsets = [3, 0], sizes = [1, 4], strides = [1, 1]} : vector<4x4xf32> to vector<1x4xf32>
    %26 = vector.broadcast %24 : vector<3x1xf32> to vector<3x4xf32>
    %27 = vector.broadcast %25 : vector<1x4xf32> to vector<3x4xf32>
    %28 = arith.mulf %26, %27 : vector<3x4xf32>
    %29 = arith.addf %23, %28 : vector<3x4xf32>
    %30 = vector.shape_cast %29 : vector<3x4xf32> to vector<1x3x4xf32>
    %cst = arith.constant dense<0.000000e+00> : vector<1xf32>
    %31 = vector.multi_reduction <add>, %30, %cst [1, 2] : vector<1x3x4xf32> to vector<1xf32>
    %32 = vector.shape_cast %31 : vector<1xf32> to vector<1x1x1xf32>
    %33 = vector.extract %32[0, 0, 0] : f32 from vector<1x1x1xf32>
    %cst_7 = arith.constant 0.000000e+00 : f32
    %34 = arith.cmpf ogt, %33, %cst_7 : f32
    %cst_8 = arith.constant 1.000000e+00 : f32
    %cst_9 = arith.constant -1.000000e+00 : f32
    %35 = arith.select %34, %cst_8, %cst_9 : f32
    %36 = vector.broadcast %35 : f32 to vector<3x4xf32>
    %37 = arith.mulf %29, %36 : vector<3x4xf32>
    %38 = arith.addf %37, %1 : vector<3x4xf32>
    %39 = math.tanh %38 : vector<3x4xf32>
    %c0_10 = arith.constant 0 : index
    %c0_11 = arith.constant 0 : index
    %40 = vector.load %arg4[%c0_10, %c0_11] : memref<3x4xf32, #tpu.memory_space<vmem>>, vector<3x4xf32>
    tpu.vector_store %arg4[%c0_10, %c0_11], %39 {strides = array<i32>} : memref<3x4xf32, #tpu.memory_space<vmem>>, vector<3x4xf32>,
    return
  }
}

</mosaic_0001>

<bundles_post_ra>
// kernel: tpu_custom_call.1
= control target key start
LH: loop header
LB: loop body
LE: loop exit
PB: predicated region body
PF: predicated region fallthrough
CT: control target
= control target key end

     0   :  { %9 = vsyncpa [#allocation3], 0  ;;  %s292_s0 = inlined_call_operand.hbm [shape: f32[3,4], index: 0, kind: input, shape index: {}]   ;;  %s293_s1 = inlined_call_operand.hbm [shape: f32[3,4], index: 1, kind: input, shape index: {}]   ;;  %s294_s2 = inlined_call_operand.vmem [shape: f32[4,4], index: 2, kind: input, shape index: {}]   ;;  %s295_s3 = inlined_call_operand.vmem [shape: f32[1,4], index: 3, kind: input, shape index: {}]   ;;  %s296_s4 = inlined_call_operand.hbm [shape: f32[3,4], index: 4, kind: output, shape index: {}]  }
   0x1   :  { %10 = vsyncpa [#allocation6], 0 }
   0x2   :  { %11 = vsyncpa [#allocation4], 0  ;;  %s216_s15 = smov [#allocation2]   ;;  %s217_s17 = smov [#allocation5]  }
   0x3   :  { %s18_s16 = sshll.u32 %s216_s15, 4  ;;  %s28_s18 = sshll.u32 %s217_s17, 4  ;;  %s19_s16 = int_to_ptr.vmem [resolvable:$true] %s18_s16  ;;  %s29_s18 = int_to_ptr.vmem [resolvable:$true] %s28_s18 }
   0x4   :  { %s144_s21 = scalar_lea.hbm %s292_s0, 64 }
   0x5   :  { %p145_p0 = scmp.ne.s32.totalorder %s292_s0, %s144_s21  ;;  %p148_p1 = scmp.lt.u32.totalorder %s144_s21, %s292_s0 }
   0x7   :  { %p150_p2 = pnand %p148_p1, %p145_p0 }
   0x9   :  { %153 = shalt.err (!%p150_p2)
}
   0xa   :  { %s154_s26 = scalar_lea.vmem %s19_s16, 64  ;;  %p159_p4 = scmp.lt.s32.totalorder %s19_s16, %s19_s16 }
   0xb   :  { %p155_p3 = scmp.ne.s32.totalorder %s19_s16, %s154_s26  ;;  %p160_p5 = scmp.lt.s32.totalorder %s154_s26, %s154_s26 }
   0xd   :  { %p161_p6 = por %p160_p5, %p159_p4 }
   0xf   :  { %p162_p7 = pnand %p161_p6, %p155_p3 }
  0x11   :  { %165 = shalt.err (!%p162_p7)
}
  0x12   :  { %21 = dma.hbm_to_vmem [thread:$0]  %s292_s0, 64, %s19_s16, [#allocation3]  }
  0x13   :  { %s166_s5 = scalar_lea.hbm %s293_s1, 64 }
  0x14   :  { %p167_p8 = scmp.ne.s32.totalorder %s293_s1, %s166_s5  ;;  %p170_p9 = scmp.lt.u32.totalorder %s166_s5, %s293_s1 }
  0x16   :  { %p172_p10 = pnand %p170_p9, %p167_p8 }
  0x18   :  { %175 = shalt.err (!%p172_p10)
}
  0x19   :  { %s176_s10 = scalar_lea.vmem %s29_s18, 64  ;;  %p181_p12 = scmp.lt.s32.totalorder %s29_s18, %s29_s18 }
  0x1a   :  { %p177_p11 = scmp.ne.s32.totalorder %s29_s18, %s176_s10  ;;  %p182_p13 = scmp.lt.s32.totalorder %s176_s10, %s176_s10 }
  0x1c   :  { %p183_p0 = por %p182_p13, %p181_p12 }
  0x1e   :  { %p184_p1 = pnand %p183_p0, %p177_p11 }
  0x20   :  { %187 = shalt.err (!%p184_p1)
}
  0x21   :  { %31 = dma.hbm_to_vmem [thread:$0]  %s293_s1, 64, %s29_s18, [#allocation6]  }
  0x22   :  { %210 = dma.done.wait [#allocation3], 64  }
  0x23   :  { %211 = vsyncadd [#allocation3], 4294967232 }
  0x24   :  { %212 = dma.done.wait [#allocation6], 64  }
  0x25   :  { %213 = vsyncadd [#allocation6], 4294967232  ;;  %v218_v0 = vmov 0   ;;  %v219_v1 = vmov 2   ;;  %v42_v2 = vld [vmem:[#allocation2] sm:$0x7]  ;;  %v57_v5 = vlaneseq }
  0x26   :  { %137 = vset.pattern.permute.xlu0 %v218_v0  ;;  %139 = vset.pattern.permute.xlu1 %v219_v1  ;;  %v220_v3 = vmov 1   ;;  %v221_v4 = vmov 3   ;;  %v44_v8 = vld [vmem:[%s294_s2] sm:$0xf]  ;;  %vm93_vm0 = vcmask 26624   ;;  %s222_s15 = smov [#allocation7]  }
  0x27   :  { %54 = vperm.xlu0 %137, %v42_v2   ;;  %74 = vperm.xlu1 %139, %v42_v2   ;;  %v58_v6 = vshrl.u32 %v57_v5, 7  ;;  %v127_v17 = vld [vmem:[%s295_s3] ss:$0 sm:$0xff]  ;;  %v43_v37 = vld [vmem:[#allocation5] sm:$0x7]  ;;  %s117_s16 = sshll.u32 %s222_s15, 4  ;;  %s118_s16 = int_to_ptr.vmem [resolvable:$true] %s117_s16 }
  0x28   :  { %s188_s17 = scalar_lea.vmem %s118_s16, 64  ;;  %p193_p4 = scmp.lt.s32.totalorder %s118_s16, %s118_s16 }
  0x29   :  { %v59_v7 = vsub.s32 0, %v58_v6  ;;  %v69_v10 = vsub.s32 1, %v58_v6  ;;  %v79_v12 = vsub.s32 2, %v58_v6  ;;  %v89_v14 = vsub.s32 3, %v58_v6  ;;  %p189_p3 = scmp.ne.s32.totalorder %s118_s16, %s188_s17  ;;  %p194_p5 = scmp.lt.s32.totalorder %s188_s17, %s188_s17 }
  0x2b   :  { %138 = vset.pattern.permute.xlu0 %v220_v3  ;;  %140 = vset.pattern.permute.xlu1 %v221_v4  ;;  %v60_v9 = vrot.slane %v44_v8, %v59_v7  ;;  %v70_v16 = vrot.slane %v44_v8, %v69_v10  ;;  %v80_v18 = vrot.slane %v44_v8, %v79_v12  ;;  %p195_p6 = por %p194_p5, %p193_p4 }
  0x2c   :  { %64 = vperm.xlu0 %138, %v42_v2   ;;  %84 = vperm.xlu1 %140, %v42_v2   ;;  %v90_v19 = vrot.slane %v44_v8, %v89_v14 }
  0x2d   :  { %p196_p7 = pnand %p195_p6, %p189_p3 }
  0x30   :  { %141 = vset.pattern.permute.xlu0 %v221_v4 }
  0xa6   :  { %v55_v11 = vpop.permute.xlu0 %54  ;;  %v75_v13 = vpop.permute.xlu1 %74 }
  0xa7   :  { %v61_v15 = vmul.f32 %v60_v9, %v55_v11  ;;  %v81_v24 = vmul.f32 %v80_v18, %v75_v13 }
  0xa9   :  { %v62_v22 = vadd.f32 %v127_v17, %v61_v15 }
  0xab   :  { %v65_v20 = vpop.permute.xlu0 %64  ;;  %v85_v21 = vpop.permute.xlu1 %84 }
  0xac   :  { %v71_v23 = vmul.f32 %v70_v16, %v65_v20  ;;  %v91_v26 = vmul.f32 %v90_v19, %v85_v21 }
  0xae   :  { %v72_v25 = vadd.f32 %v71_v23, %v62_v22 }
  0xb0   :  { %v82_v27 = vadd.f32 %v81_v24, %v72_v25 }
  0xb2   :  { %v92_v28 = vadd.f32 %v91_v26, %v82_v27 }
  0xb4   :  { %v94_v29 = vsel %vm93_vm0, %v92_v28, 0.0 }
  0xb5   :  { %95 = vadd.xlane.f32.xlu1 %v94_v29 }
 0x142   :  { %v96_v30 = vpop.xlane.xlu1 %95 }
 0x143   :  { %v97_v31 = vrot.slane %v96_v30, 4 }
 0x145   :  { %v98_v32 = vadd.f32 %v97_v31, %v96_v30 }
 0x147   :  { %v99_v33 = vrot.slane %v98_v32, 2 }
 0x149   :  { %v100_v34 = vadd.f32 %v99_v33, %v98_v32 }
 0x14b   :  { %v101_v35 = vrot.slane %v100_v34, 1 }
 0x14d   :  { %v102_v36 = vadd.f32 %v101_v35, %v100_v34 }
 0x14f   :  { %128 = vpush %v102_v36 }
 0x180   :  { %s129_s2 = spop %128 }
 0x181   :  { %p104_p2 = scmp.gt.f32.partialorder %s129_s2, 0.0 }
 0x183   :  { %s105_s3 = scalar_select %p104_p2, 1.0, -1.0 }
 0x185   :  { %v106_v38 = vstv %s105_s3 }
 0x186   :  { %v107_v39 = vmul.f32 %v106_v38, %v92_v28 }
 0x188   :  { %v108_v40 = vadd.f32 %v107_v39, %v43_v37 }
 0x18a   :  { %142 = vtanh.f32 %v108_v40 }
 0x194   :  { %v143_v41 = vpop.eup %142 }
 0x195   :  { %110 = vst.msk [vmem:[#allocation7] sm:$0x7] %vm93_vm0, %v143_v41 }
 0x196   :  { %199 = shalt.err (!%p196_p7)
}
 0x197   :  { %s200_s20 = scalar_lea.hbm %s296_s4, 64 }
 0x198   :  { %p201_p8 = scmp.ne.s32.totalorder %s296_s4, %s200_s20  ;;  %p204_p9 = scmp.lt.u32.totalorder %s200_s20, %s296_s4 }
 0x19a   :  { %p206_p10 = pnand %p204_p9, %p201_p8 }
 0x19c   :  { %209 = shalt.err (!%p206_p10)
}
 0x19d   :  { %120 = dma.vmem_to_hbm [thread:$0]  %s118_s16, 64, %s296_s4, [#allocation4]  }
 0x19e   :  { %214 = dma.done.wait [#allocation4], 64  }
 0x19f   :  { %215 = vsyncadd [#allocation4], 4294967232 }
 0x1a0   :  { %124 = vsyncpa [#allocation3], 1 }
 0x1a1   :  { %125 = vsyncpa [#allocation6], 1 }
 0x1a2   :  { %126 = vsyncpa [#allocation4], 1 }

</bundles_post_ra>
